<compile_context>
chip_gen: v5e
topology: v5e:2x2
jax: 0.10.0
libtpu: 0.0.40
codegen_flags: <defaults>
</compile_context>

<pallas_src>
import jax
import jax.numpy as jnp
from jax.experimental import pallas as pl
from jax.experimental.pallas import tpu as pltpu


def _cdiv(a, b):
    return -(-a // b)


def _round_up(a, b):
    return _cdiv(a, b) * b


def _vmem_budget_bytes() -> int:
    """Per-generation usable VMEM budget (v7x: 64 MiB/TC, v5e/v6e: 128 MiB)."""
    cap = 64 << 20
    try:
        info = pltpu.get_tpu_info()
        cap = int(getattr(info, "vmem_capacity_bytes", cap))
    except Exception:
        pass
    return int(min(cap * 3 // 4, 100 << 20))


def _padded_bytes(rows, cols, itemsize):
    """VMEM footprint of a (rows, cols) buffer, (8*packing, 128)-tile padded."""
    itemsize = int(itemsize)
    sub = 8 * max(1, 4 // itemsize)
    return _round_up(rows, sub) * _round_up(cols, 128) * itemsize


# ----------------------------- kernels ---------------------------------------


def _make_stats_kernel(tile_s: int, s_total: int, mask_tail: bool):
    """Per-row (centered) sum / sum-of-squares, lane-reduced within each tile."""

    def kernel(x_ref, c_ref, s1_ref, s2_ref):
        t = pl.program_id(1)

        @pl.when(t == 0)
        def _():
            s1_ref[...] = jnp.zeros_like(s1_ref)
            s2_ref[...] = jnp.zeros_like(s2_ref)

        # Center at the prior running_mean (per row) before squaring: avoids
        # E[x^2] - mean^2 catastrophic cancellation for large M.
        xc = x_ref[...].astype(jnp.float32) - c_ref[...]        # (RB, TILE_S)
        if mask_tail:
            lane = jax.lax.broadcasted_iota(jnp.int32, xc.shape, 1)
            xc = jnp.where(lane + t * tile_s < s_total, xc, 0.0)
        # In-step lane reduction into tiny (RB, 1) accumulators (no full-width
        # scratch RMW -> no extra store-slot pressure, frees VMEM).
        s1_ref[...] += jnp.sum(xc, axis=-1, keepdims=True)
        s2_ref[...] += jnp.sum(xc * xc, axis=-1, keepdims=True)

    return kernel


def _norm_kernel(scale_ref, shift_ref, x_ref, o_ref):
    xf = x_ref[...].astype(jnp.float32)                          # (RB, TILE_S)
    o_ref[...] = (xf * scale_ref[...] + shift_ref[...]).astype(o_ref.dtype)


def _make_fused_kernel(prior: float, eps: float, m: int):
    """VMEM-resident variant: read x once, stats + normalize, write once."""
    inv_m = 1.0 / m

    def kernel(x_ref, rm_ref, rv_ref, w_ref, b_ref, o_ref):
        xf = x_ref[...].astype(jnp.float32)                      # (N, C, S)
        rm = rm_ref[...]                                         # (C, 1)
        xc = xf - rm[None, :, :]
        s1 = jnp.sum(jnp.sum(xc, axis=0), axis=-1, keepdims=True)       # (C,1)
        s2 = jnp.sum(jnp.sum(xc * xc, axis=0), axis=-1, keepdims=True)  # (C,1)
        mean = rm + s1 * inv_m
        var_u = (s2 - (s1 * s1) * inv_m) / (m - 1.0)   # unbiased (m==1 -> inf, like torch)
        bm = prior * rm + (1.0 - prior) * mean
        bv = prior * rv_ref[...] + (1.0 - prior) * var_u
        scale = w_ref[...] * jax.lax.rsqrt(bv + eps)
        shift = b_ref[...] - bm * scale
        o_ref[...] = (xf * scale[None, :, :] + shift[None, :, :]).astype(o_ref.dtype)

    return kernel


# ----------------------------- wrapper ----------------------------------------


def bayesian_batch_norm_3d(x, running_mean, running_var, weight, bias, *,
                           prior: float, eps: float = 1e-5,
                           force_two_pass: bool = False,
                           max_tile_lanes: int = 32 * 1024,
                           max_block_rows: int = 1024,
                           target_block_bytes=None):
    """x: (N, C, D, H, W); per-channel params of shape (C,). Output dtype = x.dtype."""
    N, C, D, H, W = x.shape
    S = D * H * W
    NR = N * C
    M = N * S
    itemsize = int(jnp.dtype(x.dtype).itemsize)
    prior = float(prior)
    eps = float(eps)

    budget = _vmem_budget_bytes()
    if target_block_bytes is None:
        target_block_bytes = int(min(4 << 20, max(1 << 20, budget // 16)))

    rm = running_mean.astype(jnp.float32).reshape(C, 1)
    rv = running_var.astype(jnp.float32).reshape(C, 1)
    w = weight.astype(jnp.float32).reshape(C, 1)
    b = bias.astype(jnp.float32).reshape(C, 1)

    # ---------------- fused, VMEM-resident path (2x HBM traffic) -------------
    fused_bytes = (2 * N * _padded_bytes(C, S, itemsize)     # x in + out (native)
                   + 3 * N * _padded_bytes(C, S, 4)          # f32 temporaries
                   + (2 << 20))
    if (not force_two_pass) and fused_bytes <= budget:
        x3 = x.reshape(N, C, S)                               # free reshape
        out3 = pl.pallas_call(
            _make_fused_kernel(prior, eps, M),
            out_shape=jax.ShapeDtypeStruct((N, C, S), x.dtype),
            compiler_params=pltpu.CompilerParams(vmem_limit_bytes=int(budget)),
            cost_estimate=pl.CostEstimate(
                flops=int(5 * N * C * S), transcendentals=int(C),
                bytes_accessed=int(2 * N * C * S * itemsize + 4 * C * 4)),
        )(x3, rm, rv, w, b)
        return out3.reshape(N, C, D, H, W)

    # ---------------- streamed two-pass path (3x HBM traffic) ----------------
    x2 = x.reshape(NR, S)                  # free, contiguous; channel = row % C

    # lane (spatial) tile: full S if it fits, else a big multiple of 128
    if S <= max_tile_lanes:
        tile_s = S
    else:
        tile_s = max(128, (max_tile_lanes // 128) * 128)
    n_tiles = _cdiv(S, tile_s)
    mask_tail = (S % tile_s) != 0

    # row block: enough (n, c) rows to reach ~target_block_bytes per block
    rows_target = max(8, target_block_bytes // max(1, tile_s * itemsize))
    rows_target = min(rows_target, max_block_rows)
    if NR <= rows_target:
        rb = NR                            # full dim (OK even if not mult of 8)
    else:
        rb = max(8, (rows_target // 8) * 8)
    n_rb = _cdiv(NR, rb)

    # per-row centering constant = running_mean[channel of row]
    center_rows = jnp.tile(rm.reshape(C), N).reshape(NR, 1)

    # -------- pass 1: per-row partial stats (parallel rows, arbitrary tiles) --
    s1, s2 = pl.pallas_call(
        _make_stats_kernel(tile_s, S, mask_tail),
        out_shape=(jax.ShapeDtypeStruct((NR, 1), jnp.float32),
                   jax.ShapeDtypeStruct((NR, 1), jnp.float32)),
        grid=(n_rb, n_tiles),
        in_specs=[
            pl.BlockSpec((rb, tile_s), lambda r, t: (r, t)),
            pl.BlockSpec((rb, 1), lambda r, t: (r, 0)),
        ],
        out_specs=(pl.BlockSpec((rb, 1), lambda r, t: (r, 0)),
                   pl.BlockSpec((rb, 1), lambda r, t: (r, 0))),
        compiler_params=pltpu.CompilerParams(
            dimension_semantics=("parallel", "arbitrary"),
            vmem_limit_bytes=int(budget)),
        cost_estimate=pl.CostEstimate(
            flops=int(4 * NR * S), transcendentals=0,
            bytes_accessed=int(NR * S * itemsize + 3 * NR * 4)),
    )(x2, center_rows)

    # -------- tiny O(C) finish in plain JAX: combine, blend, fuse scale/shift --
    s1c = s1.reshape(N, C).sum(axis=0)
    s2c = s2.reshape(N, C).sum(axis=0)
    rm1 = rm.reshape(C)
    mean = rm1 + s1c / M
    var_u = (s2c - s1c * s1c / M) / (M - 1.0)
    bm = prior * rm1 + (1.0 - prior) * mean
    bv = prior * rv.reshape(C) + (1.0 - prior) * var_u
    scale_c = w.reshape(C) * jax.lax.rsqrt(bv + eps)
    shift_c = b.reshape(C) - bm * scale_c
    scale_rows = jnp.tile(scale_c, N).reshape(NR, 1)
    shift_rows = jnp.tile(shift_c, N).reshape(NR, 1)

    # -------- pass 2: streamed normalize: out = x * scale + shift -------------
    out2 = pl.pallas_call(
        _norm_kernel,
        out_shape=jax.ShapeDtypeStruct((NR, S), x.dtype),
        grid=(n_rb, n_tiles),
        in_specs=[
            pl.BlockSpec((rb, 1), lambda r, t: (r, 0)),
            pl.BlockSpec((rb, 1), lambda r, t: (r, 0)),
            pl.BlockSpec((rb, tile_s), lambda r, t: (r, t)),
        ],
        out_specs=pl.BlockSpec((rb, tile_s), lambda r, t: (r, t)),
        compiler_params=pltpu.CompilerParams(
            dimension_semantics=("parallel", "parallel"),
            vmem_limit_bytes=int(budget)),
        cost_estimate=pl.CostEstimate(
            flops=int(2 * NR * S), transcendentals=0,
            bytes_accessed=int(2 * NR * S * itemsize + 2 * NR * 4)),
    )(scale_rows, shift_rows, x2)

    return out2.reshape(N, C, D, H, W)


# ----------------------------- reference & test --------------------------------


def _reference(x, running_mean, running_var, weight, bias, prior, eps):
    """Pure-JAX reference mirroring the PyTorch forward."""
    axes = (0, 2, 3, 4)
    m = x.shape[0] * x.shape[2] * x.shape[3] * x.shape[4]
    batch_mean = jnp.mean(x, axis=axes)
    batch_var_unbiased = jnp.sum(
        (x - batch_mean[None, :, None, None, None]) ** 2, axis=axes) / (m - 1.0)
    bm = prior * running_mean + (1 - prior) * batch_mean
    bv = prior * running_var + (1 - prior) * batch_var_unbiased
    bm = bm[None, :, None, None, None]
    bv = bv[None, :, None, None, None]
    w = weight[None, :, None, None, None]
    b = bias[None, :, None, None, None]
    return (x - bm) / jnp.sqrt(bv + eps) * w + b


if __name__ == "__main__":
    prior = 0.3
    eps = 1e-5

    def run_case(case_key, shape, force_two_pass, **kw):
        C = shape[1]
        k_x, k_rm, k_rv, k_w, k_b = jax.random.split(case_key, 5)
        x = 1.5 * jax.random.normal(k_x, shape, dtype=jnp.float32) + 0.25
        rmean = 0.1 * jax.random.normal(k_rm, (C,), dtype=jnp.float32)
        rvar = 1.0 + 0.1 * jax.random.uniform(k_rv, (C,), dtype=jnp.float32)
        wgt = 1.0 + 0.05 * jax.random.normal(k_w, (C,), dtype=jnp.float32)
        bias = 0.05 * jax.random.normal(k_b, (C,), dtype=jnp.float32)

        out = bayesian_batch_norm_3d(x, rmean, rvar, wgt, bias,
                                     prior=prior, eps=eps,
                                     force_two_pass=force_two_pass, **kw)
        out = jax.block_until_ready(out)
        ref = _reference(x, rmean, rvar, wgt, bias, prior, eps)
        err = float(jnp.max(jnp.abs(out - ref)))
        assert out.shape == shape, f"shape mismatch: {out.shape} vs {shape}"
        assert err < 2e-4, f"{shape} two_pass={force_two_pass}: err={err}"

    root = jax.random.PRNGKey(0)
    k1, k2, k3 = jax.random.split(root, 3)

    # 1) fused VMEM-resident path (default dispatch for small tensors)
    run_case(k1, (2, 4, 4, 8, 8), force_two_pass=False)
    # 2) streamed two-pass path, spatial divides the tile exactly
    run_case(k2, (2, 4, 4, 8, 8), force_two_pass=True)
    # 3) streamed two-pass path with ragged tails on both row and lane axes
    run_case(k3, (3, 4, 2, 10, 10), force_two_pass=True,
             max_tile_lanes=128, max_block_rows=8)

    print("KERNEL_OK")
</pallas_src>

<mosaic_0001>
module attributes {stable_mosaic.version = 11 : i64} {
  func.func @kernel(%arg0: memref<2x4x256xf32, #tpu.memory_space<vmem>>, %arg1: memref<4x1xf32, #tpu.memory_space<vmem>>, %arg2: memref<4x1xf32, #tpu.memory_space<vmem>>, %arg3: memref<4x1xf32, #tpu.memory_space<vmem>>, %arg4: memref<4x1xf32, #tpu.memory_space<vmem>>, %arg5: memref<2x4x256xf32, #tpu.memory_space<vmem>>) attributes {dimension_semantics = [], scalar_prefetch = 0 : i64, scratch_operands = 0 : i64, tpu.core_type = #tpu.core_type<tc>} {
    %c0 = arith.constant 0 : index
    %c0_0 = arith.constant 0 : index
    %c0_1 = arith.constant 0 : index
    %0 = vector.load %arg0[%c0, %c0_0, %c0_1] : memref<2x4x256xf32, #tpu.memory_space<vmem>>, vector<2x4x256xf32>
    %c0_2 = arith.constant 0 : index
    %c0_3 = arith.constant 0 : index
    %1 = vector.load %arg1[%c0_2, %c0_3] : memref<4x1xf32, #tpu.memory_space<vmem>>, vector<4x1xf32>
    %2 = vector.shape_cast %1 : vector<4x1xf32> to vector<1x4x1xf32>
    %3 = vector.broadcast %2 : vector<1x4x1xf32> to vector<2x4x256xf32>
    %4 = arith.subf %0, %3 : vector<2x4x256xf32>
    %cst = arith.constant dense<0.000000e+00> : vector<4x256xf32>
    %5 = vector.multi_reduction <add>, %4, %cst [0] : vector<2x4x256xf32> to vector<4x256xf32>
    %cst_4 = arith.constant dense<0.000000e+00> : vector<4xf32>
    %6 = vector.multi_reduction <add>, %5, %cst_4 [1] : vector<4x256xf32> to vector<4xf32>
    %7 = vector.shape_cast %6 : vector<4xf32> to vector<4x1xf32>
    %8 = arith.mulf %4, %4 : vector<2x4x256xf32>
    %cst_5 = arith.constant dense<0.000000e+00> : vector<4x256xf32>
    %9 = vector.multi_reduction <add>, %8, %cst_5 [0] : vector<2x4x256xf32> to vector<4x256xf32>
    %cst_6 = arith.constant dense<0.000000e+00> : vector<4xf32>
    %10 = vector.multi_reduction <add>, %9, %cst_6 [1] : vector<4x256xf32> to vector<4xf32>
    %11 = vector.shape_cast %10 : vector<4xf32> to vector<4x1xf32>
    %cst_7 = arith.constant 0.001953125 : f32
    %12 = vector.broadcast %cst_7 : f32 to vector<4x1xf32>
    %13 = arith.mulf %7, %12 : vector<4x1xf32>
    %14 = arith.addf %1, %13 : vector<4x1xf32>
    %15 = arith.mulf %7, %7 : vector<4x1xf32>
    %cst_8 = arith.constant 0.001953125 : f32
    %16 = vector.broadcast %cst_8 : f32 to vector<4x1xf32>
    %17 = arith.mulf %15, %16 : vector<4x1xf32>
    %18 = arith.subf %11, %17 : vector<4x1xf32>
    %cst_9 = arith.constant 5.110000e+02 : f32
    %19 = vector.broadcast %cst_9 : f32 to vector<4x1xf32>
    %20 = arith.divf %18, %19 : vector<4x1xf32>
    %cst_10 = arith.constant 3.000000e-01 : f32
    %21 = vector.broadcast %cst_10 : f32 to vector<4x1xf32>
    %22 = arith.mulf %21, %1 : vector<4x1xf32>
    %cst_11 = arith.constant 0.699999988 : f32
    %23 = vector.broadcast %cst_11 : f32 to vector<4x1xf32>
    %24 = arith.mulf %23, %14 : vector<4x1xf32>
    %25 = arith.addf %22, %24 : vector<4x1xf32>
    %c0_12 = arith.constant 0 : index
    %c0_13 = arith.constant 0 : index
    %26 = vector.load %arg2[%c0_12, %c0_13] : memref<4x1xf32, #tpu.memory_space<vmem>>, vector<4x1xf32>
    %cst_14 = arith.constant 3.000000e-01 : f32
    %27 = vector.broadcast %cst_14 : f32 to vector<4x1xf32>
    %28 = arith.mulf %27, %26 : vector<4x1xf32>
    %cst_15 = arith.constant 0.699999988 : f32
    %29 = vector.broadcast %cst_15 : f32 to vector<4x1xf32>
    %30 = arith.mulf %29, %20 : vector<4x1xf32>
    %31 = arith.addf %28, %30 : vector<4x1xf32>
    %c0_16 = arith.constant 0 : index
    %c0_17 = arith.constant 0 : index
    %32 = vector.load %arg3[%c0_16, %c0_17] : memref<4x1xf32, #tpu.memory_space<vmem>>, vector<4x1xf32>
    %cst_18 = arith.constant 9.99999974E-6 : f32
    %33 = vector.broadcast %cst_18 : f32 to vector<4x1xf32>
    %34 = arith.addf %31, %33 : vector<4x1xf32>
    %35 = math.rsqrt %34 : vector<4x1xf32>
    %36 = arith.mulf %32, %35 : vector<4x1xf32>
    %c0_19 = arith.constant 0 : index
    %c0_20 = arith.constant 0 : index
    %37 = vector.load %arg4[%c0_19, %c0_20] : memref<4x1xf32, #tpu.memory_space<vmem>>, vector<4x1xf32>
    %38 = arith.mulf %25, %36 : vector<4x1xf32>
    %39 = arith.subf %37, %38 : vector<4x1xf32>
    %40 = vector.shape_cast %36 : vector<4x1xf32> to vector<1x4x1xf32>
    %41 = vector.broadcast %40 : vector<1x4x1xf32> to vector<2x4x256xf32>
    %42 = arith.mulf %0, %41 : vector<2x4x256xf32>
    %43 = vector.shape_cast %39 : vector<4x1xf32> to vector<1x4x1xf32>
    %44 = vector.broadcast %43 : vector<1x4x1xf32> to vector<2x4x256xf32>
    %45 = arith.addf %42, %44 : vector<2x4x256xf32>
    %c0_21 = arith.constant 0 : index
    %c0_22 = arith.constant 0 : index
    %c0_23 = arith.constant 0 : index
    %46 = vector.load %arg5[%c0_21, %c0_22, %c0_23] : memref<2x4x256xf32, #tpu.memory_space<vmem>>, vector<2x4x256xf32>
    tpu.vector_store %arg5[%c0_21, %c0_22, %c0_23], %45 {strides = array<i32>} : memref<2x4x256xf32, #tpu.memory_space<vmem>>, vector<2x4x256xf32>,
    return
  }
}

</mosaic_0001>

<bundles_post_ra>
// kernel: tpu_custom_call.1
= control target key start
LH: loop header
LB: loop body
LE: loop exit
PB: predicated region body
PF: predicated region fallthrough
CT: control target
= control target key end

     0   :  { %v203_v1 = vmov 0   ;;  %s290_s0 = inlined_call_operand.vmem [shape: f32[2,4,256], index: 0, kind: input, shape index: {}]   ;;  %s291_s1 = inlined_call_operand.vmem [shape: f32[4,1], index: 1, kind: input, shape index: {}]   ;;  %s292_s2 = inlined_call_operand.vmem [shape: f32[4,1], index: 2, kind: input, shape index: {}]   ;;  %s293_s3 = inlined_call_operand.vmem [shape: f32[4,1], index: 3, kind: input, shape index: {}]   ;;  %s294_s4 = inlined_call_operand.vmem [shape: f32[4,1], index: 4, kind: input, shape index: {}]   ;;  %s295_s5 = inlined_call_operand.hbm [shape: f32[2,4,256], index: 5, kind: output, shape index: {}]  }
   0x1   :  { %v242_v0 = vld [vmem:[%s291_s1] sm:$0xf]  ;;  %170 = vset.pattern.permute.xlu0 %v203_v1  ;;  %171 = vset.pattern.permute.xlu1 %v203_v1 }
   0x2   :  { %10 = vsyncpa [#allocation3], 0  ;;  %26 = vperm.xlu0 %170, %v242_v0   ;;  %172 = vset.pattern.permute.xlu2 %v203_v1  ;;  %v204_v2 = vmov 839922192   ;;  %v250_v6 = vld [vmem:[%s290_s0] sm:$0xff]  ;;  %v255_v7 = vld [vmem:[%s290_s0 + $0x8] sm:$0xff] }
   0x3   :  { %v29_v3 = vunpack.c.l.s4 %v204_v2  ;;  %vm48_vm0 = vcmask 1043456   ;;  %v205_v39 = vmov 511.0   ;;  %v102_v49 = vld [vmem:[%s292_s2] sm:$0xf]  ;;  %v99_v1 = vmul.f32 0.3, %v242_v0 }
   0x4   :  { %173 = vrcp.f32 %v205_v39  ;;  %v103_v52 = vmul.f32 0.3, %v102_v49  ;;  %s206_s27 = smov [#allocation2]   ;;  %s152_s30 = sshll.u32 %s295_s5, 4  ;;  %s153_s30 = int_to_ptr.hbm [resolvable:$true] %s152_s30 }
   0x5   :  { %v245_v4 = vunpack.c.0.s8 %v29_v3  ;;  %v106_v3 = vld [vmem:[%s293_s3] sm:$0xf]  ;;  %s150_s3 = sshll.u32 %s206_s27, 4  ;;  %s208_s6 = smov 8   ;;  %s151_s3 = int_to_ptr.vmem [resolvable:$true] %s150_s3 }
   0xa   :  { %v174_v40 = vpop.eup %173 }
   0xb   :  { %v92_v41 = vmul.f32 511.0, %v174_v40  ;;  %vm96_vm1 = vweird.f32 %v174_v40 }
   0xd   :  { %v93_v42 = vsub.f32 1.0, %v92_v41 }
   0xf   :  { %v94_v44 = vmul.f32 %v174_v40, %v93_v42 }
  0x11   :  { %v95_v46 = vadd.f32 %v174_v40, %v94_v44 }
  0x13   :  { %v97_v48 = vsel %vm96_vm1, %v174_v40, %v95_v46 }
  0x74   :  { %v27_v5 = vpop.permute.xlu0 %26 }
  0x75   :  { %v31_v8 = vperm.slane %v27_v5, %v245_v4 }
  0x77   :  { %v33_v9 = vsub.f32 %v250_v6, %v31_v8  ;;  %v34_v10 = vsub.f32 %v255_v7, %v31_v8 }
  0x79   :  { %37 = vst [vmem:[#allocation1] ss:$2 sm:$0xff] %v33_v9  ;;  %v60_v11 = vmul.f32 %v33_v9, %v33_v9  ;;  %v61_v14 = vmul.f32 %v34_v10, %v34_v10 }
  0x7a   :  { %41 = vst [vmem:[#allocation1 + $0x10] ss:$2 sm:$0xff] %v34_v10 }
  0x80   :  { %v38_v12 = vld.sshfl [vmem:[#allocation1] sm:$0xff pattern:$0x75316420]  ;;  %v39_v13 = vld.sshfl [vmem:[#allocation1 + $0x8] sm:$0xff pattern:$0x75316420] }
  0x81   :  { %v42_v15 = vld.sshfl [vmem:[#allocation1 + $0x10] sm:$0xff pattern:$0x75316420]  ;;  %v43_v16 = vld.sshfl [vmem:[#allocation1 + $0x18] sm:$0xff pattern:$0x75316420] }
  0x82   :  { %v49_v17 = vsel %vm48_vm0, %v38_v12, 0.0  ;;  %v50_v18 = vsel %vm48_vm0, %v42_v15, 0.0  ;;  %v52_v19 = vsel %vm48_vm0, %v39_v13, 0.0  ;;  %v53_v20 = vsel %vm48_vm0, %v43_v16, 0.0  ;;  %64 = vst [vmem:[#allocation1] ss:$2 sm:$0xff] %v60_v11 }
  0x83   :  { %v51_v21 = vadd.f32 %v50_v18, %v49_v17  ;;  %v54_v22 = vadd.f32 %v53_v20, %v52_v19  ;;  %68 = vst [vmem:[#allocation1 + $0x10] ss:$2 sm:$0xff] %v61_v14  ;;  %v119_v11 = vld [vmem:[%s294_s4] sm:$0xf]  ;;  %s207_s4 = smov 128  }
  0x85   :  { %v55_v23 = vsel %vm48_vm0, %v51_v21, 0.0  ;;  %v56_v24 = vsel %vm48_vm0, %v54_v22, 0.0 }
  0x86   :  { %v57_v25 = vadd.f32 %v56_v24, %v55_v23 }
  0x88   :  { %58 = vadd.xlane.f32.xlu0 %v57_v25 }
  0x89   :  { %v65_v26 = vld.sshfl [vmem:[#allocation1] sm:$0xff pattern:$0x75316420]  ;;  %v66_v27 = vld.sshfl [vmem:[#allocation1 + $0x8] sm:$0xff pattern:$0x75316420] }
  0x8a   :  { %v69_v28 = vld.sshfl [vmem:[#allocation1 + $0x10] sm:$0xff pattern:$0x75316420]  ;;  %v70_v29 = vld.sshfl [vmem:[#allocation1 + $0x18] sm:$0xff pattern:$0x75316420] }
  0x8b   :  { %v75_v30 = vsel %vm48_vm0, %v65_v26, 0.0  ;;  %v76_v31 = vsel %vm48_vm0, %v69_v28, 0.0  ;;  %v78_v32 = vsel %vm48_vm0, %v66_v27, 0.0  ;;  %v79_v33 = vsel %vm48_vm0, %v70_v29, 0.0 }
  0x8c   :  { %v77_v34 = vadd.f32 %v76_v31, %v75_v30  ;;  %v80_v35 = vadd.f32 %v79_v33, %v78_v32 }
  0x8e   :  { %v81_v36 = vsel %vm48_vm0, %v77_v34, 0.0  ;;  %v82_v37 = vsel %vm48_vm0, %v80_v35, 0.0 }
  0x8f   :  { %v83_v38 = vadd.f32 %v82_v37, %v81_v36 }
  0x91   :  { %84 = vadd.xlane.f32.xlu1 %v83_v38 }
  0xfb   :  { %v59_v43 = vpop.xlane.xlu0 %58 }
  0xfc   :  { %v88_v45 = vmul.f32 %v59_v43, %v59_v43  ;;  %v86_v58 = vmul.f32 0.001953125, %v59_v43 }
  0xfe   :  { %v89_v47 = vmul.f32 0.001953125, %v88_v45  ;;  %v87_v61 = vadd.f32 %v86_v58, %v242_v0 }
 0x100   :  { %v100_v2 = vmul.f32 0.7, %v87_v61 }
 0x102   :  { %v101_v9 = vadd.f32 %v100_v2, %v99_v1 }
 0x104   :  { %v85_v50 = vpop.xlane.xlu1 %84 }
 0x105   :  { %v90_v51 = vsub.f32 %v85_v50, %v89_v47 }
 0x107   :  { %v98_v53 = vmul.f32 %v97_v48, %v90_v51 }
 0x109   :  { %v104_v54 = vmul.f32 0.7, %v98_v53 }
 0x10b   :  { %v105_v55 = vadd.f32 %v104_v54, %v103_v52 }
 0x10d   :  { %v107_v56 = vadd.f32 1e-05, %v105_v55 }
 0x10f   :  { %175 = vrsqrt.f32 %v107_v56  ;;  %vm114_vm3 = vweird.f32 %v107_v56 }
 0x115   :  { %v176_v57 = vpop.eup %175 }
 0x116   :  { %v109_v59 = vmul.f32 %v176_v57, %v107_v56  ;;  %vm115_vm2 = vweird.f32 %v176_v57 }
 0x117   :  { %vm116_vm4 = vmor %vm114_vm3, %vm115_vm2 }
 0x118   :  { %v110_v60 = vmul.f32 %v176_v57, %v109_v59 }
 0x11a   :  { %v111_v62 = vmul.f32 0.5, %v110_v60 }
 0x11c   :  { %v112_v63 = vsub.f32 1.5, %v111_v62 }
 0x11e   :  { %v113_v5 = vmul.f32 %v176_v57, %v112_v63 }
 0x120   :  { %v117_v8 = vsel %vm116_vm4, %v176_v57, %v113_v5 }
 0x121   :  { %v118_v10 = vmul.f32 %v117_v8, %v106_v3 }
 0x123   :  { %124 = vperm.xlu1 %171, %v118_v10   ;;  %v120_v12 = vmul.f32 %v118_v10, %v101_v9 }
 0x125   :  { %v121_v13 = vsub.f32 %v119_v11, %v120_v12 }
 0x127   :  { %135 = vperm.xlu2 %172, %v121_v13  }
 0x181   :  { %v136_v0 = vpop.permute.xlu2 %135 }
 0x182   :  { %v140_v16 = vperm.slane %v136_v0, %v245_v4 }
 0x195   :  { %v125_v14 = vpop.permute.xlu1 %124 }
 0x196   :  { %v129_v15 = vperm.slane %v125_v14, %v245_v4 }
 0x198   :  { %v131_v17 = vmul.f32 %v129_v15, %v250_v6  ;;  %v132_v18 = vmul.f32 %v129_v15, %v255_v7 }
 0x19a   :  { %v142_v19 = vadd.f32 %v140_v16, %v131_v17  ;;  %v143_v20 = vadd.f32 %v140_v16, %v132_v18 }
 0x19c   :  { %144 = vst [vmem:[#allocation2] sm:$0xff] %v142_v19 }
 0x19d   :  { %145 = vst [vmem:[#allocation2 + $0x8] sm:$0xff] %v143_v20 }
 0x19e   :  { %158 = dma.vmem_to_hbm [thread:$0]  %s151_s3, 256, %s153_s30, [#allocation3], %s207_s4, %s207_s4, %s208_s6  }
 0x19f   :  { %201 = dma.done.wait [#allocation3], 256  }
 0x1a0   :  { %202 = vsyncadd [#allocation3], 4294967040 }
 0x1a1   :  { %163 = vsyncpa [#allocation3], 1 }

</bundles_post_ra>
